<compile_context>
chip_gen: v6e
topology: v6e:2x2x1
jax: 0.10.0
libtpu: 0.0.40
codegen_flags: <defaults>
</compile_context>

<pallas_src>
import math

import jax
import jax.numpy as jnp
from jax.experimental import pallas as pl
from jax.experimental.pallas import tpu as pltpu

K = 5            # SubMConv3d kernel_size
KVOL = K ** 3    # 125 kernel offsets
LANE = 128


def _round_up(x, m):
    return (x + m - 1) // m * m


# ---------------------------------------------------------------- Pallas GEMM
def _embed_gemm_kernel(x_ref, w_ref, o_ref):
    # One (tm, Kp) @ (Kp, Cout) MXU matmul per M tile, f32 accumulation.
    o_ref[...] = jnp.dot(x_ref[...], w_ref[...],
                         preferred_element_type=jnp.float32).astype(o_ref.dtype)


def pallas_embed_gemm(x, w, *, tm):
    """x: (Mp, Kp) bf16 @ w: (Kp, Cout) bf16 -> (Mp, Cout) f32.

    Mp % tm == 0, tm % 16 == 0, Kp % 128 == 0.  Cout is the true (unpadded)
    output width: the out block's last dim equals the full array dim, so the
    (8,128) rule is satisfied and writeback traffic is minimal.  W is tiny and
    kept fully resident (same block every grid step); the M axis is the only
    grid axis and is marked parallel (megacore sharding on v7x).
    """
    mp, kp = x.shape
    _, cout = w.shape
    assert mp % tm == 0 and tm % 16 == 0
    assert kp % LANE == 0

    cost = pl.CostEstimate(
        flops=2 * mp * kp * cout,
        transcendentals=0,
        bytes_accessed=mp * kp * 2 + kp * cout * 2 + mp * cout * 4)

    return pl.pallas_call(
        _embed_gemm_kernel,
        out_shape=jax.ShapeDtypeStruct((mp, cout), jnp.float32),
        grid_spec=pltpu.PrefetchScalarGridSpec(
            num_scalar_prefetch=0,
            grid=(mp // tm,),
            in_specs=[pl.BlockSpec((tm, kp), lambda i: (i, 0)),
                      pl.BlockSpec((kp, cout), lambda i: (0, 0))],
            out_specs=pl.BlockSpec((tm, cout), lambda i: (i, 0))),
        compiler_params=pltpu.CompilerParams(
            dimension_semantics=("parallel",),
            vmem_limit_bytes=32 * 1024 * 1024),
        cost_estimate=cost,
    )(x, w)


# ------------------------------------------------------------------ JAX glue
def build_neighbor_table(grid_coord, batch):
    """nbr[n, k] = index of the active point at grid_coord[n] + offset_k in the
    same batch element, or -1 if inactive.  (N, KVOL) int32.

    Sorted-key (voxel hash) lookup: O(KVOL * N log N), no N x N intermediates.
    Assumes (batch, grid_coord) pairs are unique (true for submanifold sites).
    """
    n = grid_coord.shape[0]
    r = jnp.arange(K, dtype=jnp.int32) - (K // 2)
    offs = jnp.stack(jnp.meshgrid(r, r, r, indexing="ij"), -1).reshape(KVOL, 3)

    dims = jnp.max(grid_coord, axis=0) + 1                        # (3,) i32
    nb = jnp.max(batch) + 1

    # int32 key-space overflow guard (only checkable when inputs are concrete;
    # under jit the caller must guarantee the bound).
    # TODO(synk): switch to 2-level (batch-segmented) keys for huge grids.
    try:
        span = int(nb) * int(dims[0]) * int(dims[1]) * int(dims[2])
    except Exception:
        span = None
    if span is not None and span >= 2 ** 31:
        raise ValueError("voxel-hash key space exceeds int32; use segmented keys")

    def encode(b, c):
        key = b
        for d in range(3):
            key = key * dims[d] + c[..., d]
        return key

    keys = encode(batch, grid_coord)                              # (N,)
    order = jnp.argsort(keys).astype(jnp.int32)
    keys_sorted = keys[order]

    tgt = grid_coord[:, None, :] + offs[None, :, :]               # (N, KVOL, 3)
    in_range = jnp.all((tgt >= 0) & (tgt < dims[None, None, :]), axis=-1)
    tgt_keys = encode(batch[:, None], tgt)                        # (N, KVOL)

    pos = jnp.searchsorted(keys_sorted, tgt_keys)                 # (N, KVOL)
    pos_c = jnp.clip(pos, 0, n - 1)
    found = in_range & (keys_sorted[pos_c] == tgt_keys)
    return jnp.where(found, order[pos_c], -1).astype(jnp.int32)


def build_padded_im2col(feat, nbr, mp, kp):
    """feat (N, Cin) f32, nbr (N, KVOL) i32 -> (mp, kp) bf16 im2col matrix.

    feat is cast to bf16 before the 125x gather; invalid neighbors, padded rows
    and padded kernel-offset columns all point at an appended zero row of feat,
    so the only pads/wheres happen on the small int32 index array and the
    gather writes the final padded bf16 X in one pass.
    """
    n, cin = feat.shape
    kvol = nbr.shape[1]
    assert kp % cin == 0 and kp >= kvol * cin
    kvol_p = kp // cin

    feat_ext = jnp.concatenate(
        [feat.astype(jnp.bfloat16), jnp.zeros((1, cin), jnp.bfloat16)], axis=0)
    idx = jnp.where(nbr >= 0, nbr, n)                             # (N, KVOL)
    idx = jnp.pad(idx, ((0, mp - n), (0, kvol_p - kvol)), constant_values=n)
    return feat_ext[idx].reshape(mp, kp)                          # (mp, kp) bf16


def embedding_forward(point, weight, *, tm=2048):
    """Embedding.forward: point.feat <- SubMConv3d(point.feat).

    point: dict with 'feat' (N,Cin) f32, 'grid_coord' (N,3) i32, 'batch' (N,) i32.
    weight: (K, K, K, Cin, Cout) f32.
    norm_layer / act_layer are None in this module config -> stem == conv only.
    """
    feat = point["feat"]
    n, cin = feat.shape
    cout = weight.shape[-1]

    nbr = build_neighbor_table(point["grid_coord"], point["batch"])   # (N, KVOL)

    # Reduction dim: smallest multiple of both 128 (lane alignment) and Cin
    # (so padding is expressible purely through the gather index).
    kp = _round_up(KVOL * cin, cin * LANE // math.gcd(cin, LANE))

    # M tile: large (fewer grid steps, bigger DMAs), multiple of 16 (bf16
    # sublane packing), but capped so the grid has >= 2 steps whenever
    # possible so both v7x TensorCores get work.
    tm_eff = min(tm, max(16, _round_up(-(-n // 2), 16)))
    mp = _round_up(n, tm_eff)

    x = build_padded_im2col(feat, nbr, mp, kp)                        # (mp, kp) bf16
    w = weight.reshape(KVOL * cin, cout).astype(jnp.bfloat16)         # (KVOL*Cin, Cout)
    w = jnp.pad(w, ((0, kp - KVOL * cin), (0, 0)))                    # (kp, Cout)

    out_feat = pallas_embed_gemm(x, w, tm=tm_eff)[:n]                 # (N, Cout) f32

    out = dict(point)
    out["feat"] = out_feat
    return out


# -------------------------------------------------------------------- driver
if __name__ == "__main__":
    key = jax.random.PRNGKey(0)
    k_feat, k_w, k_c0, k_c1 = jax.random.split(key, 4)

    in_channels, embed_channels = 4, 32
    pts_per_batch, n_batches = 32, 2
    n = pts_per_batch * n_batches

    # unique grid coordinates per batch element inside an 8^3 grid
    def coords(k):
        cells = jax.random.permutation(k, 8 ** 3)[:pts_per_batch]
        return jnp.stack([cells // 64, (cells // 8) % 8, cells % 8],
                         axis=-1).astype(jnp.int32)

    grid_coord = jnp.concatenate([coords(k_c0), coords(k_c1)], axis=0)   # (N,3)
    batch = jnp.repeat(jnp.arange(n_batches, dtype=jnp.int32), pts_per_batch)
    feat = jax.random.normal(k_feat, (n, in_channels), dtype=jnp.float32)

    # deterministic SubMConv3d weights (kernel_size=5, bias=False)
    fan_in = KVOL * in_channels
    weight = (jax.random.normal(k_w, (K, K, K, in_channels, embed_channels),
                                dtype=jnp.float32) / jnp.sqrt(fan_in))

    point = {"feat": feat, "grid_coord": grid_coord, "batch": batch,
             "offset": jnp.array([pts_per_batch, n], dtype=jnp.int32)}

    out_point = jax.jit(embedding_forward)(point, weight)
    out = jax.block_until_ready(out_point["feat"])
    assert out.shape == (n, embed_channels) and out.dtype == jnp.float32

    # --- correctness checks -------------------------------------------------
    # 1) neighbor table: sorted-key lookup vs. brute-force all-pairs reference
    nbr = build_neighbor_table(grid_coord, batch)                        # (N,KVOL)
    r = jnp.arange(K, dtype=jnp.int32) - (K // 2)
    offs = jnp.stack(jnp.meshgrid(r, r, r, indexing="ij"), -1).reshape(KVOL, 3)
    tgt = grid_coord[:, None, :] + offs[None, :, :]                      # (N,KVOL,3)
    match = (jnp.all(tgt[:, :, None, :] == grid_coord[None, None, :, :], axis=-1)
             & (batch[:, None, None] == batch[None, None, :]))
    nbr_ref = jnp.where(jnp.any(match, axis=-1),
                        jnp.argmax(match, axis=-1).astype(jnp.int32), -1)
    assert jnp.array_equal(nbr, nbr_ref)

    # 2) submanifold conv output vs. plain-JAX f32 reference
    #    (kernel uses bf16 inputs + f32 MXU accumulation -> relaxed tolerance)
    gathered = jnp.where((nbr >= 0)[..., None], feat[jnp.clip(nbr, 0), :], 0.0)
    ref = jnp.einsum("nkc,kco->no", gathered,
                     weight.reshape(KVOL, in_channels, embed_channels))
    assert jnp.allclose(out, ref, atol=2e-2, rtol=2e-2)

    print("KERNEL_OK")
</pallas_src>

<mosaic_0001>
module attributes {stable_mosaic.version = 11 : i64} {
  func.func @_embed_gemm_kernel(%arg0: i32, %arg1: memref<32x512xbf16, #tpu.memory_space<vmem>>, %arg2: memref<512x32xbf16, #tpu.memory_space<vmem>>, %arg3: memref<32x32xf32, #tpu.memory_space<vmem>>) attributes {dimension_semantics = [#tpu.dimension_semantics<parallel>], iteration_bounds = array<i64: 2>, scalar_prefetch = 0 : i64, scratch_operands = 0 : i64, tpu.core_type = #tpu.core_type<tc>, window_params = [{transform_indices = @transform_0, window_bounds = array<i64: 32, 512>}, {pipeline_mode = #tpu.pipeline_mode<synchronous>, transform_indices = @transform_1, window_bounds = array<i64: 512, 32>}, {transform_indices = @transform_2, window_bounds = array<i64: 32, 32>}]} {
    %c0 = arith.constant 0 : index
    %c0_0 = arith.constant 0 : index
    %0 = vector.load %arg1[%c0, %c0_0] : memref<32x512xbf16, #tpu.memory_space<vmem>>, vector<32x512xbf16>
    %c0_1 = arith.constant 0 : index
    %c0_2 = arith.constant 0 : index
    %1 = vector.load %arg2[%c0_1, %c0_2] : memref<512x32xbf16, #tpu.memory_space<vmem>>, vector<512x32xbf16>
    %cst = arith.constant dense<0.000000e+00> : vector<32x32xf32>
    %2 = tpu.matmul %0, %1, %cst {dimension_numbers = #tpu.dot_dimension_numbers<[1], [0], [0], [1], [0, 0, 1, 1], [], []>} : vector<32x512xbf16>, vector<512x32xbf16>, vector<32x32xf32> -> vector<32x32xf32>
    %c0_3 = arith.constant 0 : index
    %c0_4 = arith.constant 0 : index
    %3 = vector.load %arg3[%c0_3, %c0_4] : memref<32x32xf32, #tpu.memory_space<vmem>>, vector<32x32xf32>
    tpu.vector_store %arg3[%c0_3, %c0_4], %2 {strides = array<i32>} : memref<32x32xf32, #tpu.memory_space<vmem>>, vector<32x32xf32>,
    return
  }
  func.func @transform_0(%arg0: i32) -> (i32, i32) {
    %c0_i32 = arith.constant 0 : i32
    %c0_i32_0 = arith.constant 0 : i32
    return %arg0, %c0_i32 : i32, i32
  }
  func.func @transform_1(%arg0: i32) -> (i32, i32) {
    %c0_i32 = arith.constant 0 : i32
    %c0_i32_0 = arith.constant 0 : i32
    %c0_i32_1 = arith.constant 0 : i32
    return %c0_i32, %c0_i32_0 : i32, i32
  }
  func.func @transform_2(%arg0: i32) -> (i32, i32) {
    %c0_i32 = arith.constant 0 : i32
    %c0_i32_0 = arith.constant 0 : i32
    return %arg0, %c0_i32 : i32, i32
  }
}

</mosaic_0001>

<bundles_post_ra>
// kernel: custom-call
= control target key start
LH: loop header
LB: loop body
LE: loop exit
PB: predicated region body
PF: predicated region fallthrough
CT: control target
= control target key end

     0   :  { %s6_s0 = inlined_call_operand.vmem [shape: u32[64,125], index: 0, kind: output, shape index: {}]  }

// kernel: squeeze.6
= control target key start
LH: loop header
LB: loop body
LE: loop exit
PB: predicated region body
PF: predicated region fallthrough
CT: control target
= control target key end

     0   :  { %vm30_vm0 = vcmask 64512   ;;  %vm16_vm1 = vcmask 39936   ;;  %vm44_vm2 = vcmask 89088   ;;  %s1191_s12 = smov 126   ;;  %s1192_s17 = smov 120   ;;  %vm58_vm3 = vcmask 113664   ;;  %s2023_s0 = inlined_call_operand.vmem [shape: s32[8000], index: 0, kind: input, shape index: {}]   ;;  %s2024_s1 = inlined_call_operand.vmem [shape: s32[64,125], index: 1, kind: output, shape index: {}]  }
   0x1   :  { %v879_v0 = vld [vmem:[%s2023_s0 + $0x29] sm:$0x1]   ;;  %v885_v1 = vld [vmem:[%s2023_s0 + $0x27] sm:$0x1]   ;;  %v886_v2 = vld [vmem:[%s2023_s0 + $0x28] sm:$0x1]  }
   0x2   :  { %7 = vrot.lane.b32.xlu0 %v879_v0, %s1191_s12  ;;  %v31_v3 = vsel %vm30_vm0, %v886_v2, %v885_v1  ;;  %v881_v4 = vld [vmem:[%s2023_s0 + $0x28] sm:$0x1]   ;;  %v882_v5 = vld [vmem:[%s2023_s0 + $0x29] sm:$0x1]   ;;  %v889_v7 = vld [vmem:[%s2023_s0 + $0x26] sm:$0x1]  }
   0x3   :  { %32 = vrot.lane.b32.xlu1 %v31_v3, %s1192_s17  ;;  %v17_v6 = vsel %vm16_vm1, %v882_v5, %v881_v4  ;;  %v890_v8 = vld [vmem:[%s2023_s0 + $0x27] sm:$0x1]   ;;  %v893_v10 = vld [vmem:[%s2023_s0 + $0x25] sm:$0x1]   ;;  %v894_v11 = vld [vmem:[%s2023_s0 + $0x26] sm:$0x1]  }
   0x4   :  { %v45_v9 = vsel %vm44_vm2, %v890_v8, %v889_v7  ;;  %v897_v12 = vld [vmem:[%s2023_s0 + $0x24] sm:$0x1]   ;;  %v898_v13 = vld [vmem:[%s2023_s0 + $0x25] sm:$0x1]   ;;  %vm72_vm4 = vcmask 138240   ;;  %s1193_s30 = smov 123   ;;  %v59_v14 = vsel %vm58_vm3, %v894_v11, %v893_v10 }
   0x5   :  { %s1194_s2 = smov 117   ;;  %v73_v15 = vsel %vm72_vm4, %v898_v13, %v897_v12  ;;  %v901_v16 = vld [vmem:[%s2023_s0 + $0x23] sm:$0x1]   ;;  %v902_v17 = vld [vmem:[%s2023_s0 + $0x24] sm:$0x1]   ;;  %vm86_vm5 = vcmask 162816  }
   0x6   :  { %18 = vrot.lane.b32.xlu0 %v17_v6, %s1193_s30  ;;  %v905_v18 = vld [vmem:[%s2023_s0 + $0x22] sm:$0x1]   ;;  %v906_v19 = vld [vmem:[%s2023_s0 + $0x23] sm:$0x1]   ;;  %vm100_vm6 = vcmask 187392   ;;  %s1195_s11 = smov 114   ;;  %v87_v20 = vsel %vm86_vm5, %v902_v17, %v901_v16 }
   0x7   :  { %46 = vrot.lane.b32.xlu1 %v45_v9, %s1194_s2  ;;  %s1196_s12 = smov 111   ;;  %v101_v21 = vsel %vm100_vm6, %v906_v19, %v905_v18  ;;  %v909_v22 = vld [vmem:[%s2023_s0 + $0x21] sm:$0x1]   ;;  %v910_v23 = vld [vmem:[%s2023_s0 + $0x22] sm:$0x1]   ;;  %vm114_vm7 = vcmask 211968  }
   0x8   :  { %v913_v24 = vld [vmem:[%s2023_s0 + $0x20] sm:$0x1]   ;;  %v914_v25 = vld [vmem:[%s2023_s0 + $0x21] sm:$0x1]   ;;  %vm128_vm8 = vcmask 236544   ;;  %s1197_s21 = smov 108   ;;  %v115_v26 = vsel %vm114_vm7, %v910_v23, %v909_v22 }
   0x9   :  { %s1198_s22 = smov 105   ;;  %v129_v27 = vsel %vm128_vm8, %v914_v25, %v913_v24  ;;  %v917_v28 = vld [vmem:[%s2023_s0 + $0x1f] sm:$0x1]   ;;  %v918_v29 = vld [vmem:[%s2023_s0 + $0x20] sm:$0x1]   ;;  %vm142_vm9 = vcmask 261120  }
   0xa   :  { %60 = vrot.lane.b32.xlu0 %v59_v14, %s1195_s11  ;;  %v921_v30 = vld [vmem:[%s2023_s0 + $0x1e] sm:$0x1]   ;;  %v922_v31 = vld [vmem:[%s2023_s0 + $0x1f] sm:$0x1]   ;;  %vm156_vm10 = vcmask 285696   ;;  %s1199_s2 = smov 102   ;;  %v143_v32 = vsel %vm142_vm9, %v918_v29, %v917_v28 }
   0xb   :  { %74 = vrot.lane.b32.xlu1 %v73_v15, %s1196_s12  ;;  %s1200_s3 = smov 99   ;;  %v157_v33 = vsel %vm156_vm10, %v922_v31, %v921_v30  ;;  %v925_v34 = vld [vmem:[%s2023_s0 + $0x1d] sm:$0x1]   ;;  %v926_v35 = vld [vmem:[%s2023_s0 + $0x1e] sm:$0x1]   ;;  %vm170_vm11 = vcmask 310272  }
   0xc   :  { %v929_v36 = vld [vmem:[%s2023_s0 + $0x1c] sm:$0x1]   ;;  %v930_v37 = vld [vmem:[%s2023_s0 + $0x1d] sm:$0x1]   ;;  %vm184_vm12 = vcmask 334848   ;;  %s1201_s12 = smov 96   ;;  %v171_v38 = vsel %vm170_vm11, %v926_v35, %v925_v34 }
   0xd   :  { %s1202_s13 = smov 93   ;;  %v185_v39 = vsel %vm184_vm12, %v930_v37, %v929_v36  ;;  %v933_v40 = vld [vmem:[%s2023_s0 + $0x1b] sm:$0x1]   ;;  %v934_v41 = vld [vmem:[%s2023_s0 + $0x1c] sm:$0x1]   ;;  %vm198_vm13 = vcmask 359424  }
   0xe   :  { %88 = vrot.lane.b32.xlu0 %v87_v20, %s1197_s21  ;;  %v937_v42 = vld [vmem:[%s2023_s0 + $0x1a] sm:$0x1]   ;;  %v938_v43 = vld [vmem:[%s2023_s0 + $0x1b] sm:$0x1]   ;;  %vm212_vm14 = vcmask 384000   ;;  %s1204_s23 = smov 87   ;;  %v199_v44 = vsel %vm198_vm13, %v934_v41, %v933_v40 }
   0xf   :  { %102 = vrot.lane.b32.xlu1 %v101_v21, %s1198_s22  ;;  %s1203_s22 = smov 90   ;;  %v213_v45 = vsel %vm212_vm14, %v938_v43, %v937_v42  ;;  %v941_v46 = vld [vmem:[%s2023_s0 + $0x19] sm:$0x1]   ;;  %v942_v47 = vld [vmem:[%s2023_s0 + $0x1a] sm:$0x1]   ;;  %vm226_vm15 = vcmask 408576  }
  0x10   :  { %v945_v48 = vld [vmem:[%s2023_s0 + $0x18] sm:$0x1]   ;;  %v946_v49 = vld [vmem:[%s2023_s0 + $0x19] sm:$0x1]   ;;  %vm240_vm0 = vcmask 433152   ;;  %s1206_s4 = smov 81   ;;  %v227_v50 = vsel %vm226_vm15, %v942_v47, %v941_v46 }
  0x11   :  { %v241_v51 = vsel %vm240_vm0, %v946_v49, %v945_v48  ;;  %v949_v52 = vld [vmem:[%s2023_s0 + $0x17] sm:$0x1]   ;;  %v950_v53 = vld [vmem:[%s2023_s0 + $0x18] sm:$0x1]   ;;  %vm254_vm1 = vcmask 457728   ;;  %vm268_vm2 = vcmask 482304  }
  0x12   :  { %116 = vrot.lane.b32.xlu0 %v115_v26, %s1199_s2  ;;  %v953_v54 = vld [vmem:[%s2023_s0 + $0x16] sm:$0x1]   ;;  %v954_v55 = vld [vmem:[%s2023_s0 + $0x17] sm:$0x1]   ;;  %s1208_s14 = smov 75   ;;  %v255_v56 = vsel %vm254_vm1, %v950_v53, %v949_v52  ;;  %vm282_vm3 = vcmask 506880  }
  0x13   :  { %130 = vrot.lane.b32.xlu1 %v129_v27, %s1200_s3  ;;  %s1205_s3 = smov 84   ;;  %v269_v57 = vsel %vm268_vm2, %v954_v55, %v953_v54  ;;  %v957_v58 = vld [vmem:[%s2023_s0 + $0x15] sm:$0x1]   ;;  %v958_v59 = vld [vmem:[%s2023_s0 + $0x16] sm:$0x1]   ;;  %vm296_vm4 = vcmask 531456  }
  0x14   :  { %v961_v60 = vld [vmem:[%s2023_s0 + $0x14] sm:$0x1]   ;;  %v962_v61 = vld [vmem:[%s2023_s0 + $0x15] sm:$0x1]   ;;  %s1210_s24 = smov 69   ;;  %v283_v62 = vsel %vm282_vm3, %v958_v59, %v957_v58  ;;  %vm310_vm5 = vcmask 547840  }
  0x15   :  { %v297_v63 = vsel %vm296_vm4, %v962_v61, %v961_v60  ;;  %v965_v0 = vld [vmem:[%s2023_s0 + $0x3d] sm:$0x1]   ;;  %v966_v1 = vld [vmem:[%s2023_s0 + $0x3e] sm:$0x1]   ;;  %v969_v2 = vld [vmem:[%s2023_s0 + $0x13] sm:$0x1]  }
  0x16   :  { %144 = vrot.lane.b32.xlu0 %v143_v32, %s1201_s12  ;;  %v970_v3 = vld [vmem:[%s2023_s0 + $0x14] sm:$0x1]   ;;  %vm324_vm6 = vcmask 556032   ;;  %s1212_s5 = smov 63   ;;  %v311_v4 = vsel %vm310_vm5, %v966_v1, %v965_v0  ;;  %v973_v6 = vld [vmem:[%s2023_s0 + $0x3c] sm:$0x1]  }
  0x17   :  { %158 = vrot.lane.b32.xlu1 %v157_v33, %s1202_s13  ;;  %s1207_s13 = smov 78   ;;  %v325_v5 = vsel %vm324_vm6, %v970_v3, %v969_v2  ;;  %v974_v7 = vld [vmem:[%s2023_s0 + $0x3d] sm:$0x1]   ;;  %vm338_vm7 = vcmask 572416   ;;  %v977_v8 = vld [vmem:[%s2023_s0 + $0x12] sm:$0x1]  }
  0x18   :  { %v978_v9 = vld [vmem:[%s2023_s0 + $0x13] sm:$0x1]   ;;  %vm352_vm8 = vcmask 580608   ;;  %s1214_s15 = smov 60   ;;  %v339_v10 = vsel %vm338_vm7, %v974_v7, %v973_v6  ;;  %v981_v12 = vld [vmem:[%s2023_s0 + $0x3b] sm:$0x1]  }
  0x19   :  { %v353_v11 = vsel %vm352_vm8, %v978_v9, %v977_v8  ;;  %v982_v13 = vld [vmem:[%s2023_s0 + $0x3c] sm:$0x1]   ;;  %vm366_vm9 = vcmask 596992   ;;  %v985_v14 = vld [vmem:[%s2023_s0 + $0x11] sm:$0x1]   ;;  %vm380_vm10 = vcmask 605184  }
  0x1a   :  { %172 = vrot.lane.b32.xlu0 %v171_v38, %s1203_s22  ;;  %v986_v15 = vld [vmem:[%s2023_s0 + $0x12] sm:$0x1]   ;;  %s1216_s25 = smov 57   ;;  %v367_v16 = vsel %vm366_vm9, %v982_v13, %v981_v12  ;;  %v989_v18 = vld [vmem:[%s2023_s0 + $0x3a] sm:$0x1]   ;;  %vm394_vm11 = vcmask 621568  }
  0x1b   :  { %186 = vrot.lane.b32.xlu1 %v185_v39, %s1204_s23  ;;  %s1209_s23 = smov 72   ;;  %v381_v17 = vsel %vm380_vm10, %v986_v15, %v985_v14  ;;  %v990_v19 = vld [vmem:[%s2023_s0 + $0x3b] sm:$0x1]   ;;  %v993_v20 = vld [vmem:[%s2023_s0 + $0x10] sm:$0x1]   ;;  %vm408_vm12 = vcmask 629760  }
  0x1c   :  { %v994_v21 = vld [vmem:[%s2023_s0 + $0x11] sm:$0x1]   ;;  %s1218_s6 = smov 54   ;;  %v395_v22 = vsel %vm394_vm11, %v990_v19, %v989_v18  ;;  %v997_v24 = vld [vmem:[%s2023_s0 + $0x39] sm:$0x1]   ;;  %vm422_vm13 = vcmask 646144  }
  0x1d   :  { %v409_v23 = vsel %vm408_vm12, %v994_v21, %v993_v20  ;;  %v998_v25 = vld [vmem:[%s2023_s0 + $0x3a] sm:$0x1]   ;;  %v1001_v26 = vld [vmem:[%s2023_s0 + $0xf] sm:$0x1]   ;;  %v1002_v27 = vld [vmem:[%s2023_s0 + $0x10] sm:$0x1]  }
  0x1e   :  { %200 = vrot.lane.b32.xlu0 %v199_v44, %s1205_s3  ;;  %vm436_vm14 = vcmask 654336   ;;  %s1220_s16 = smov 51   ;;  %v423_v28 = vsel %vm422_vm13, %v998_v25, %v997_v24  ;;  %v1005_v30 = vld [vmem:[%s2023_s0 + $0x38] sm:$0x1]   ;;  %v1006_v31 = vld [vmem:[%s2023_s0 + $0x39] sm:$0x1]  }
  0x1f   :  { %214 = vrot.lane.b32.xlu1 %v213_v45, %s1206_s4  ;;  %s1211_s4 = smov 66   ;;  %v437_v29 = vsel %vm436_vm14, %v1002_v27, %v1001_v26  ;;  %vm450_vm15 = vcmask 670720   ;;  %v1009_v32 = vld [vmem:[%s2023_s0 + $0xe] sm:$0x1]   ;;  %v1010_v33 = vld [vmem:[%s2023_s0 + $0xf] sm:$0x1]  }
  0x20   :  { %vm464_vm0 = vcmask 678912   ;;  %s1222_s26 = smov 48   ;;  %v451_v34 = vsel %vm450_vm15, %v1006_v31, %v1005_v30  ;;  %vm3_vm1 = vcmask 1022976   ;;  %v2_v35 = vld [vmem:[%s2023_s0] sm:$0x1]   ;;  %vm478_vm2 = vcmask 695296  }
  0x21   :  { %v465_v36 = vsel %vm464_vm0, %v1010_v33, %v1009_v32  ;;  %v1013_v37 = vld [vmem:[%s2023_s0 + $0x37] sm:$0x1]   ;;  %v1014_v38 = vld [vmem:[%s2023_s0 + $0x38] sm:$0x1]   ;;  %4 = vst.msk [vmem:[%s2024_s1] sm:$0x1] %vm3_vm1, %v2_v35  }
  0x22   :  { %228 = vrot.lane.b32.xlu0 %v227_v50, %s1207_s13  ;;  %v1017_v39 = vld [vmem:[%s2023_s0 + $0xd] sm:$0x1]   ;;  %v1018_v40 = vld [vmem:[%s2023_s0 + $0xe] sm:$0x1]   ;;  %vm492_vm3 = vcmask 703488   ;;  %s1223_s10 = smov 46   ;;  %v479_v41 = vsel %vm478_vm2, %v1014_v38, %v1013_v37 }
  0x23   :  { %242 = vrot.lane.b32.xlu1 %v241_v51, %s1208_s14  ;;  %s1213_s14 = smov 61   ;;  %s1224_s11 = smov 45   ;;  %v493_v42 = vsel %vm492_vm3, %v1018_v40, %v1017_v39  ;;  %v1021_v43 = vld [vmem:[%s2023_s0 + $0x36] sm:$0x1]   ;;  %v1022_v44 = vld [vmem:[%s2023_s0 + $0x37] sm:$0x1]  }
  0x24   :  { %vm506_vm4 = vcmask 719872   ;;  %v1025_v45 = vld [vmem:[%s2023_s0 + $0xc] sm:$0x1]   ;;  %v1026_v46 = vld [vmem:[%s2023_s0 + $0xd] sm:$0x1]   ;;  %vm520_vm5 = vcmask 728064  }
  0x25   :  { %s1225_s20 = smov 43   ;;  %s1226_s21 = smov 42   ;;  %v507_v47 = vsel %vm506_vm4, %v1022_v44, %v1021_v43  ;;  %v521_v48 = vsel %vm520_vm5, %v1026_v46, %v1025_v45  ;;  %v1029_v49 = vld [vmem:[%s2023_s0 + $0x35] sm:$0x1]   ;;  %v1030_v50 = vld [vmem:[%s2023_s0 + $0x36] sm:$0x1]  }
  0x26   :  { %256 = vrot.lane.b32.xlu0 %v255_v56, %s1209_s23  ;;  %vm534_vm6 = vcmask 744448   ;;  %v1033_v51 = vld [vmem:[%s2023_s0 + $0xb] sm:$0x1]   ;;  %v1034_v52 = vld [vmem:[%s2023_s0 + $0xc] sm:$0x1]   ;;  %vm548_vm7 = vcmask 752640  }
  0x27   :  { %270 = vrot.lane.b32.xlu1 %v269_v57, %s1210_s24  ;;  %s1215_s24 = smov 58   ;;  %s1227_s30 = smov 40   ;;  %v535_v53 = vsel %vm534_vm6, %v1030_v50, %v1029_v49  ;;  %v549_v54 = vsel %vm548_vm7, %v1034_v52, %v1033_v51  ;;  %v1037_v55 = vld [vmem:[%s2023_s0 + $0x34] sm:$0x1]   ;;  %v1038_v56 = vld [vmem:[%s2023_s0 + $0x35] sm:$0x1]  }
  0x28   :  { %s1228_s2 = smov 39   ;;  %vm562_vm8 = vcmask 769024   ;;  %v1041_v57 = vld [vmem:[%s2023_s0 + $0xa] sm:$0x1]   ;;  %v1042_v58 = vld [vmem:[%s2023_s0 + $0xb] sm:$0x1]  }
  0x29   :  { %vm576_vm9 = vcmask 777216   ;;  %s1230_s12 = smov 36   ;;  %v563_v59 = vsel %vm562_vm8, %v1038_v56, %v1037_v55  ;;  %v1045_v61 = vld [vmem:[%s2023_s0 + $0x33] sm:$0x1]   ;;  %vm590_vm10 = vcmask 793600   ;;  %vm604_vm11 = vcmask 801792  }
  0x2a   :  { %284 = vrot.lane.b32.xlu0 %v283_v62, %s1211_s4  ;;  %v577_v60 = vsel %vm576_vm9, %v1042_v58, %v1041_v57  ;;  %v1046_v62 = vld [vmem:[%s2023_s0 + $0x34] sm:$0x1]   ;;  %v1050_v0 = vld [vmem:[%s2023_s0 + $0xa] sm:$0x1]   ;;  %s1232_s22 = smov 33   ;;  %vm618_vm12 = vcmask 818176  }
  0x2b   :  { %298 = vrot.lane.b32.xlu1 %v297_v63, %s1212_s5  ;;  %s1217_s5 = smov 55   ;;  %v1049_v63 = vld [vmem:[%s2023_s0 + $0x9] sm:$0x1]   ;;  %v591_v1 = vsel %vm590_vm10, %v1046_v62, %v1045_v61  ;;  %v1053_v3 = vld [vmem:[%s2023_s0 + $0x32] sm:$0x1]   ;;  %vm632_vm13 = vcmask 826368  }
  0x2c   :  { %v605_v2 = vsel %vm604_vm11, %v1050_v0, %v1049_v63  ;;  %v1058_v6 = vld [vmem:[%s2023_s0 + $0x9] sm:$0x1]   ;;  %s1234_s3 = smov 30   ;;  %v1061_v9 = vld [vmem:[%s2023_s0 + $0x31] sm:$0x1]   ;;  %vm646_vm14 = vcmask 842752  }
  0x2d   :  { %v1066_v12 = vld [vmem:[%s2023_s0 + $0x8] sm:$0x1]   ;;  %vm660_vm15 = vcmask 850944   ;;  %s1236_s13 = smov 27   ;;  %v1069_v15 = vld [vmem:[%s2023_s0 + $0x30] sm:$0x1]  }
  0x2e   :  { %312 = vrot.lane.b32.xlu0 %v311_v4, %s1213_s14  ;;  %v1054_v4 = vld [vmem:[%s2023_s0 + $0x33] sm:$0x1]   ;;  %vm674_vm0 = vcmask 867328   ;;  %v1074_v18 = vld [vmem:[%s2023_s0 + $0x7] sm:$0x1]   ;;  %vm688_vm2 = vcmask 875520  }
  0x2f   :  { %326 = vrot.lane.b32.xlu1 %v325_v5, %s1214_s15  ;;  %s1219_s15 = smov 52   ;;  %v1057_v5 = vld [vmem:[%s2023_s0 + $0x8] sm:$0x1]   ;;  %v619_v7 = vsel %vm618_vm12, %v1054_v4, %v1053_v3  ;;  %s1238_s23 = smov 24   ;;  %v1077_v21 = vld [vmem:[%s2023_s0 + $0x2f] sm:$0x1]  }
  0x30   :  { %v633_v8 = vsel %vm632_vm13, %v1058_v6, %v1057_v5  ;;  %vm702_vm3 = vcmask 891904   ;;  %v1082_v24 = vld [vmem:[%s2023_s0 + $0x6] sm:$0x1]   ;;  %vm716_vm4 = vcmask 900096   ;;  %s1240_s4 = smov 21   ;;  %vm730_vm5 = vcmask 916480  }
  0x31   :  { %v1085_v27 = vld [vmem:[%s2023_s0 + $0x2e] sm:$0x1]   ;;  %v1090_v30 = vld [vmem:[%s2023_s0 + $0x5] sm:$0x1]   ;;  %vm744_vm6 = vcmask 924672   ;;  %s1242_s14 = smov 18  }
  0x32   :  { %340 = vrot.lane.b32.xlu0 %v339_v10, %s1215_s24  ;;  %v1062_v10 = vld [vmem:[%s2023_s0 + $0x32] sm:$0x1]   ;;  %v1093_v33 = vld [vmem:[%s2023_s0 + $0x2d] sm:$0x1]   ;;  %vm758_vm7 = vcmask 941056   ;;  %vm772_vm8 = vcmask 949248  }
  0x33   :  { %354 = vrot.lane.b32.xlu1 %v353_v11, %s1216_s25  ;;  %s1221_s25 = smov 49   ;;  %v1065_v11 = vld [vmem:[%s2023_s0 + $0x7] sm:$0x1]   ;;  %v647_v13 = vsel %vm646_vm14, %v1062_v10, %v1061_v9  ;;  %v1097_v35 = vld [vmem:[%s2023_s0 + $0x3] sm:$0x1]   ;;  %s1244_s24 = smov 15  }
  0x34   :  { %v661_v14 = vsel %vm660_vm15, %v1066_v12, %v1065_v11  ;;  %v1101_v39 = vld [vmem:[%s2023_s0 + $0x2c] sm:$0x1]   ;;  %v1102_v40 = vld [vmem:[%s2023_s0 + $0x2d] sm:$0x1]   ;;  %vm786_vm9 = vcmask 965632   ;;  %vm800_vm10 = vcmask 973824  }
  0x35   :  { %v787_v43 = vsel %vm786_vm9, %v1102_v40, %v1101_v39  ;;  %v1109_v45 = vld [vmem:[%s2023_s0 + $0x2b] sm:$0x1]   ;;  %v1110_v46 = vld [vmem:[%s2023_s0 + $0x2c] sm:$0x1]   ;;  %vm814_vm11 = vcmask 990208   ;;  %vm828_vm12 = vcmask 998400  }
  0x36   :  { %368 = vrot.lane.b32.xlu0 %v367_v16, %s1217_s5  ;;  %v1070_v16 = vld [vmem:[%s2023_s0 + $0x31] sm:$0x1]   ;;  %s1246_s5 = smov 12   ;;  %v815_v49 = vsel %vm814_vm11, %v1110_v46, %v1109_v45  ;;  %vm34_vm13 = vcmask 982016   ;;  %vm37_vm14 = vcmask 1023936   ;;  %vm842_vm15 = vcmask 1014784  }
  0x37   :  { %382 = vrot.lane.b32.xlu1 %v381_v17, %s1218_s6  ;;  %v1073_v17 = vld [vmem:[%s2023_s0 + $0x6] sm:$0x1]   ;;  %v675_v19 = vsel %vm674_vm0, %v1070_v16, %v1069_v15  ;;  %v1117_v52 = vld [vmem:[%s2023_s0 + $0x2a] sm:$0x1]   ;;  %v852_v55 = vld [vmem:[%s2023_s0] sm:$0x1]  }
  0x38   :  { %v689_v20 = vsel %vm688_vm2, %v1074_v18, %v1073_v17  ;;  %v1121_v56 = vld [vmem:[%s2023_s0 + $0x1] sm:$0x1]   ;;  %vm20_vm0 = vcmask 1006592   ;;  %vm23_vm2 = vcmask 1023960   ;;  %v1125_v61 = vld [vmem:[%s2023_s0 + $0x2a] sm:$0x1]  }
  0x39   :  { %vm90_vm9 = vcmask 883712   ;;  %vm104_vm11 = vcmask 859136  }
  0x3a   :  { %396 = vrot.lane.b32.xlu0 %v395_v22, %s1219_s15  ;;  %v1078_v22 = vld [vmem:[%s2023_s0 + $0x30] sm:$0x1]   ;;  %s1248_s15 = smov 9  }
  0x3b   :  { %410 = vrot.lane.b32.xlu1 %v409_v23, %s1220_s16  ;;  %v1081_v23 = vld [vmem:[%s2023_s0 + $0x5] sm:$0x1]   ;;  %v703_v25 = vsel %vm702_vm3, %v1078_v22, %v1077_v21  ;;  %vm48_vm3 = vcmask 957440  }
  0x3c   :  { %v717_v26 = vsel %vm716_vm4, %v1082_v24, %v1081_v23  ;;  %vm51_vm4 = vcmask 1023912  }
  0x3e   :  { %424 = vrot.lane.b32.xlu0 %v423_v28, %s1221_s25  ;;  %v1086_v28 = vld [vmem:[%s2023_s0 + $0x2f] sm:$0x1]  }
  0x3f   :  { %438 = vrot.lane.b32.xlu1 %v437_v29, %s1222_s26  ;;  %v1089_v29 = vld [vmem:[%s2023_s0 + $0x4] sm:$0x1]   ;;  %v731_v31 = vsel %vm730_vm5, %v1086_v28, %v1085_v27  ;;  %s1249_s26 = smov 7   ;;  %vm62_vm5 = vcmask 932864  }
  0x40   :  { %v745_v32 = vsel %vm744_vm6, %v1090_v30, %v1089_v29  ;;  %vm65_vm6 = vcmask 1023888  }
  0x42   :  { %452 = vrot.lane.b32.xlu0 %v451_v34, %s1223_s10  ;;  %v1094_v34 = vld [vmem:[%s2023_s0 + $0x2e] sm:$0x1]   ;;  %s1251_s10 = smov 4  }
  0x43   :  { %466 = vrot.lane.b32.xlu1 %v465_v36, %s1224_s11  ;;  %s1229_s11 = smov 37   ;;  %v1098_v36 = vld [vmem:[%s2023_s0 + $0x4] sm:$0x1]   ;;  %v759_v37 = vsel %vm758_vm7, %v1094_v34, %v1093_v33  ;;  %vm76_vm7 = vcmask 908288  }
  0x44   :  { %v773_v38 = vsel %vm772_vm8, %v1098_v36, %v1097_v35  ;;  %vm79_vm8 = vcmask 1023864  }
  0x46   :  { %480 = vrot.lane.b32.xlu0 %v479_v41, %s1225_s20  ;;  %v1105_v41 = vld [vmem:[%s2023_s0 + $0x2] sm:$0x1]   ;;  %s1253_s20 = smov 1  }
  0x47   :  { %494 = vrot.lane.b32.xlu1 %v493_v42, %s1226_s21  ;;  %s1231_s21 = smov 34   ;;  %v1106_v42 = vld [vmem:[%s2023_s0 + $0x3] sm:$0x1]  }
  0x48   :  { %v801_v44 = vsel %vm800_vm10, %v1106_v42, %v1105_v41  ;;  %vm93_vm10 = vcmask 1023840  }
  0x4a   :  { %508 = vrot.lane.b32.xlu0 %v507_v47, %s1227_s30  ;;  %v1113_v47 = vld [vmem:[%s2023_s0 + $0x1] sm:$0x1]  }
  0x4b   :  { %522 = vrot.lane.b32.xlu1 %v521_v48, %s1228_s2  ;;  %s1233_s2 = smov 31   ;;  %v1114_v48 = vld [vmem:[%s2023_s0 + $0x2] sm:$0x1]  }
  0x4c   :  { %v829_v51 = vsel %vm828_vm12, %v1114_v48, %v1113_v47  ;;  %vm107_vm12 = vcmask 1023816  }
  0x4e   :  { %536 = vrot.lane.b32.xlu0 %v535_v53, %s1229_s11  ;;  %v1118_v53 = vld [vmem:[%s2023_s0 + $0x2b] sm:$0x1]  }
  0x4f   :  { %550 = vrot.lane.b32.xlu1 %v549_v54, %s1230_s12  ;;  %s1235_s12 = smov 28   ;;  %v843_v57 = vsel %vm842_vm15, %v1118_v53, %v1117_v52  ;;  %vm132_vm15 = vcmask 809984  }
  0x52   :  { %564 = vrot.lane.b32.xlu0 %v563_v59, %s1231_s21  ;;  %v856_v59 = vsel %vm3_vm1, %v1121_v56, %v852_v55 }
  0x53   :  { %578 = vrot.lane.b32.xlu1 %v577_v60, %s1232_s22  ;;  %s1237_s22 = smov 25   ;;  %v1124_v60 = vld [vmem:[%s2023_s0 + $0x29] sm:$0x1]  }
  0x56   :  { %592 = vrot.lane.b32.xlu0 %v591_v1, %s1233_s2  ;;  %s1250_s2 = smov 6  }
  0x57   :  { %606 = vrot.lane.b32.xlu1 %v605_v2, %s1234_s3  ;;  %s1239_s3 = smov 22  }
  0x5a   :  { %620 = vrot.lane.b32.xlu0 %v619_v7, %s1235_s12 }
  0x5b   :  { %634 = vrot.lane.b32.xlu1 %v633_v8, %s1236_s13  ;;  %s1241_s13 = smov 19  }
  0x5e   :  { %648 = vrot.lane.b32.xlu0 %v647_v13, %s1237_s22 }
  0x5f   :  { %662 = vrot.lane.b32.xlu1 %v661_v14, %s1238_s23  ;;  %s1243_s23 = smov 16  }
  0x62   :  { %676 = vrot.lane.b32.xlu0 %v675_v19, %s1239_s3 }
  0x63   :  { %690 = vrot.lane.b32.xlu1 %v689_v20, %s1240_s4  ;;  %s1245_s4 = smov 13  }
  0x66   :  { %704 = vrot.lane.b32.xlu0 %v703_v25, %s1241_s13 }
  0x67   :  { %718 = vrot.lane.b32.xlu1 %v717_v26, %s1242_s14  ;;  %s1247_s14 = smov 10  }
  0x6a   :  { %732 = vrot.lane.b32.xlu0 %v731_v31, %s1243_s23 }
  0x6b   :  { %746 = vrot.lane.b32.xlu1 %v745_v32, %s1244_s24 }
  0x6e   :  { %760 = vrot.lane.b32.xlu0 %v759_v37, %s1245_s4 }
  0x6f   :  { %774 = vrot.lane.b32.xlu1 %v773_v38, %s1246_s5 }
  0x72   :  { %788 = vrot.lane.b32.xlu0 %v787_v43, %s1247_s14 }
  0x73   :  { %802 = vrot.lane.b32.xlu1 %v801_v44, %s1248_s15  ;;  %s1252_s15 = smov 3  }
  0x74   :  { %v8_v50 = vpop.permute.xlu0 %7  }
  0x75   :  { %880 = vst.msk [vmem:[%s2024_s1 + $0x2a] sm:$0x1] %vm3_vm1, %v8_v50   ;;  %v33_v54 = vpop.permute.xlu1 %32   ;;  %vm869_vm1 = vcmask 1039360  }
  0x76   :  { %816 = vrot.lane.b32.xlu0 %v815_v49, %s1249_s26  ;;  %887 = vst.msk [vmem:[%s2024_s1 + $0x28] sm:$0x1] %vm34_vm13, %v33_v54   ;;  %v870_v63 = vsel %vm869_vm1, %v1125_v61, %v1124_v60  ;;  %vm118_vm13 = vcmask 834560   ;;  %vm163_vm1 = vcmask 1023720  }
  0x77   :  { %888 = vst.msk [vmem:[%s2024_s1 + $0x28] sm:$0x1] %vm37_vm14, %v33_v54   ;;  %830 = vrot.lane.b32.xlu1 %v829_v51, %s1250_s2  ;;  %vm121_vm14 = vcmask 1023792  }
  0x78   :  { %v19_v58 = vpop.permute.xlu0 %18  }
  0x79   :  { %883 = vst.msk [vmem:[%s2024_s1 + $0x29] sm:$0x1] %vm20_vm0, %v19_v58   ;;  %v47_v62 = vpop.permute.xlu1 %46   ;;  %vm135_vm0 = vcmask 1023768  }
  0x7a   :  { %884 = vst.msk [vmem:[%s2024_s1 + $0x29] sm:$0x1] %vm23_vm2, %v19_v58   ;;  %844 = vrot.lane.b32.xlu0 %v843_v57, %s1251_s10  ;;  %vm146_vm2 = vcmask 785408  }
  0x7b   :  { %891 = vst.msk [vmem:[%s2024_s1 + $0x27] sm:$0x1] %vm48_vm3, %v47_v62   ;;  %857 = vrot.lane.b32.xlu1 %v856_v59, %s1252_s15  ;;  %vm149_vm3 = vcmask 1023744  }
  0x7c   :  { %892 = vst.msk [vmem:[%s2024_s1 + $0x27] sm:$0x1] %vm51_vm4, %v47_v62   ;;  %v61_v0 = vpop.permute.xlu0 %60   ;;  %vm160_vm4 = vcmask 760832  }
  0x7d   :  { %895 = vst.msk [vmem:[%s2024_s1 + $0x26] sm:$0x1] %vm62_vm5, %v61_v0   ;;  %v75_v1 = vpop.permute.xlu1 %74   ;;  %vm174_vm5 = vcmask 736256  }
  0x7e   :  { %896 = vst.msk [vmem:[%s2024_s1 + $0x26] sm:$0x1] %vm65_vm6, %v61_v0   ;;  %871 = vrot.lane.b32.xlu0 %v870_v63, %s1253_s20  ;;  %vm177_vm6 = vcmask 1023696  }
  0x7f   :  { %899 = vst.msk [vmem:[%s2024_s1 + $0x25] sm:$0x1] %vm76_vm7, %v75_v1   ;;  %vm188_vm7 = vcmask 711680  }
  0x80   :  { %900 = vst.msk [vmem:[%s2024_s1 + $0x25] sm:$0x1] %vm79_vm8, %v75_v1   ;;  %v89_v2 = vpop.permute.xlu0 %88   ;;  %vm191_vm8 = vcmask 1023672  }
  0x81   :  { %903 = vst.msk [vmem:[%s2024_s1 + $0x24] sm:$0x1] %vm90_vm9, %v89_v2   ;;  %v103_v3 = vpop.permute.xlu1 %102   ;;  %vm202_vm9 = vcmask 687104  }
  0x82   :  { %904 = vst.msk [vmem:[%s2024_s1 + $0x24] sm:$0x1] %vm93_vm10, %v89_v2   ;;  %vm205_vm10 = vcmask 1023648  }
  0x83   :  { %907 = vst.msk [vmem:[%s2024_s1 + $0x23] sm:$0x1] %vm104_vm11, %v103_v3   ;;  %vm216_vm11 = vcmask 662528  }
  0x84   :  { %908 = vst.msk [vmem:[%s2024_s1 + $0x23] sm:$0x1] %vm107_vm12, %v103_v3   ;;  %v117_v4 = vpop.permute.xlu0 %116   ;;  %vm219_vm12 = vcmask 1023624  }
  0x85   :  { %911 = vst.msk [vmem:[%s2024_s1 + $0x22] sm:$0x1] %vm118_vm13, %v117_v4   ;;  %v131_v5 = vpop.permute.xlu1 %130   ;;  %vm230_vm13 = vcmask 637952  }
  0x86   :  { %912 = vst.msk [vmem:[%s2024_s1 + $0x22] sm:$0x1] %vm121_vm14, %v117_v4   ;;  %vm233_vm14 = vcmask 1023600  }
  0x87   :  { %915 = vst.msk [vmem:[%s2024_s1 + $0x21] sm:$0x1] %vm132_vm15, %v131_v5   ;;  %vm244_vm15 = vcmask 613376  }
  0x88   :  { %916 = vst.msk [vmem:[%s2024_s1 + $0x21] sm:$0x1] %vm135_vm0, %v131_v5   ;;  %v145_v6 = vpop.permute.xlu0 %144   ;;  %vm247_vm0 = vcmask 1023576  }
  0x89   :  { %919 = vst.msk [vmem:[%s2024_s1 + $0x20] sm:$0x1] %vm146_vm2, %v145_v6   ;;  %v159_v7 = vpop.permute.xlu1 %158   ;;  %vm258_vm2 = vcmask 588800  }
  0x8a   :  { %920 = vst.msk [vmem:[%s2024_s1 + $0x20] sm:$0x1] %vm149_vm3, %v145_v6   ;;  %vm261_vm3 = vcmask 1023552  }
  0x8b   :  { %923 = vst.msk [vmem:[%s2024_s1 + $0x1f] sm:$0x1] %vm160_vm4, %v159_v7   ;;  %vm272_vm4 = vcmask 564224  }
  0x8c   :  { %924 = vst.msk [vmem:[%s2024_s1 + $0x1f] sm:$0x1] %vm163_vm1, %v159_v7   ;;  %v173_v8 = vpop.permute.xlu0 %172   ;;  %vm275_vm1 = vcmask 1023528  }
  0x8d   :  { %927 = vst.msk [vmem:[%s2024_s1 + $0x1e] sm:$0x1] %vm174_vm5, %v173_v8   ;;  %v187_v9 = vpop.permute.xlu1 %186   ;;  %vm286_vm5 = vcmask 539648  }
  0x8e   :  { %928 = vst.msk [vmem:[%s2024_s1 + $0x1e] sm:$0x1] %vm177_vm6, %v173_v8   ;;  %vm289_vm6 = vcmask 1023504  }
  0x8f   :  { %931 = vst.msk [vmem:[%s2024_s1 + $0x1d] sm:$0x1] %vm188_vm7, %v187_v9   ;;  %vm300_vm7 = vcmask 515072  }
  0x90   :  { %932 = vst.msk [vmem:[%s2024_s1 + $0x1d] sm:$0x1] %vm191_vm8, %v187_v9   ;;  %v201_v10 = vpop.permute.xlu0 %200   ;;  %vm303_vm8 = vcmask 1023480  }
  0x91   :  { %935 = vst.msk [vmem:[%s2024_s1 + $0x1c] sm:$0x1] %vm202_vm9, %v201_v10   ;;  %v215_v11 = vpop.permute.xlu1 %214   ;;  %vm314_vm9 = vcmask 498688  }
  0x92   :  { %936 = vst.msk [vmem:[%s2024_s1 + $0x1c] sm:$0x1] %vm205_vm10, %v201_v10   ;;  %vm317_vm10 = vcmask 1023464  }
  0x93   :  { %939 = vst.msk [vmem:[%s2024_s1 + $0x1b] sm:$0x1] %vm216_vm11, %v215_v11   ;;  %vm328_vm11 = vcmask 490496  }
  0x94   :  { %940 = vst.msk [vmem:[%s2024_s1 + $0x1b] sm:$0x1] %vm219_vm12, %v215_v11   ;;  %v229_v12 = vpop.permute.xlu0 %228   ;;  %vm331_vm12 = vcmask 1023456  }
  0x95   :  { %943 = vst.msk [vmem:[%s2024_s1 + $0x1a] sm:$0x1] %vm230_vm13, %v229_v12   ;;  %v243_v13 = vpop.permute.xlu1 %242   ;;  %vm342_vm13 = vcmask 474112  }
  0x96   :  { %944 = vst.msk [vmem:[%s2024_s1 + $0x1a] sm:$0x1] %vm233_vm14, %v229_v12   ;;  %vm345_vm14 = vcmask 1023440  }
  0x97   :  { %947 = vst.msk [vmem:[%s2024_s1 + $0x19] sm:$0x1] %vm244_vm15, %v243_v13   ;;  %vm356_vm15 = vcmask 465920  }
  0x98   :  { %948 = vst.msk [vmem:[%s2024_s1 + $0x19] sm:$0x1] %vm247_vm0, %v243_v13   ;;  %v257_v14 = vpop.permute.xlu0 %256   ;;  %vm359_vm0 = vcmask 1023432  }
  0x99   :  { %951 = vst.msk [vmem:[%s2024_s1 + $0x18] sm:$0x1] %vm258_vm2, %v257_v14   ;;  %v271_v15 = vpop.permute.xlu1 %270   ;;  %vm370_vm2 = vcmask 449536  }
  0x9a   :  { %952 = vst.msk [vmem:[%s2024_s1 + $0x18] sm:$0x1] %vm261_vm3, %v257_v14   ;;  %vm373_vm3 = vcmask 1023416  }
  0x9b   :  { %955 = vst.msk [vmem:[%s2024_s1 + $0x17] sm:$0x1] %vm272_vm4, %v271_v15   ;;  %vm384_vm4 = vcmask 441344  }
  0x9c   :  { %956 = vst.msk [vmem:[%s2024_s1 + $0x17] sm:$0x1] %vm275_vm1, %v271_v15   ;;  %v285_v16 = vpop.permute.xlu0 %284   ;;  %vm387_vm1 = vcmask 1023408  }
  0x9d   :  { %959 = vst.msk [vmem:[%s2024_s1 + $0x16] sm:$0x1] %vm286_vm5, %v285_v16   ;;  %v299_v17 = vpop.permute.xlu1 %298   ;;  %vm398_vm5 = vcmask 424960  }
  0x9e   :  { %960 = vst.msk [vmem:[%s2024_s1 + $0x16] sm:$0x1] %vm289_vm6, %v285_v16   ;;  %vm401_vm6 = vcmask 1023392  }
  0x9f   :  { %963 = vst.msk [vmem:[%s2024_s1 + $0x15] sm:$0x1] %vm300_vm7, %v299_v17   ;;  %vm412_vm7 = vcmask 416768  }
  0xa0   :  { %964 = vst.msk [vmem:[%s2024_s1 + $0x15] sm:$0x1] %vm303_vm8, %v299_v17   ;;  %v313_v18 = vpop.permute.xlu0 %312   ;;  %vm415_vm8 = vcmask 1023384  }
  0xa1   :  { %967 = vst.msk [vmem:[%s2024_s1 + $0x3f] sm:$0x1] %vm314_vm9, %v313_v18   ;;  %v327_v19 = vpop.permute.xlu1 %326   ;;  %vm426_vm9 = vcmask 400384  }
  0xa2   :  { %968 = vst.msk [vmem:[%s2024_s1 + $0x3f] sm:$0x1] %vm317_vm10, %v313_v18   ;;  %vm429_vm10 = vcmask 1023368  }
  0xa3   :  { %971 = vst.msk [vmem:[%s2024_s1 + $0x14] sm:$0x1] %vm328_vm11, %v327_v19   ;;  %vm440_vm11 = vcmask 392192  }
  0xa4   :  { %972 = vst.msk [vmem:[%s2024_s1 + $0x14] sm:$0x1] %vm331_vm12, %v327_v19   ;;  %v341_v20 = vpop.permute.xlu0 %340   ;;  %vm443_vm12 = vcmask 1023360  }
  0xa5   :  { %975 = vst.msk [vmem:[%s2024_s1 + $0x3e] sm:$0x1] %vm342_vm13, %v341_v20   ;;  %v355_v21 = vpop.permute.xlu1 %354   ;;  %vm454_vm13 = vcmask 375808  }
  0xa6   :  { %976 = vst.msk [vmem:[%s2024_s1 + $0x3e] sm:$0x1] %vm345_vm14, %v341_v20   ;;  %vm457_vm14 = vcmask 1023344  }
  0xa7   :  { %979 = vst.msk [vmem:[%s2024_s1 + $0x13] sm:$0x1] %vm356_vm15, %v355_v21   ;;  %vm468_vm15 = vcmask 367616  }
  0xa8   :  { %980 = vst.msk [vmem:[%s2024_s1 + $0x13] sm:$0x1] %vm359_vm0, %v355_v21   ;;  %v369_v22 = vpop.permute.xlu0 %368   ;;  %vm471_vm0 = vcmask 1023336  }
  0xa9   :  { %983 = vst.msk [vmem:[%s2024_s1 + $0x3d] sm:$0x1] %vm370_vm2, %v369_v22   ;;  %v383_v23 = vpop.permute.xlu1 %382   ;;  %vm482_vm2 = vcmask 351232  }
  0xaa   :  { %984 = vst.msk [vmem:[%s2024_s1 + $0x3d] sm:$0x1] %vm373_vm3, %v369_v22   ;;  %vm485_vm3 = vcmask 1023320  }
  0xab   :  { %987 = vst.msk [vmem:[%s2024_s1 + $0x12] sm:$0x1] %vm384_vm4, %v383_v23   ;;  %vm496_vm4 = vcmask 343040  }
  0xac   :  { %988 = vst.msk [vmem:[%s2024_s1 + $0x12] sm:$0x1] %vm387_vm1, %v383_v23   ;;  %v397_v24 = vpop.permute.xlu0 %396   ;;  %vm499_vm1 = vcmask 1023312  }
  0xad   :  { %991 = vst.msk [vmem:[%s2024_s1 + $0x3c] sm:$0x1] %vm398_vm5, %v397_v24   ;;  %v411_v25 = vpop.permute.xlu1 %410   ;;  %vm510_vm5 = vcmask 326656  }
  0xae   :  { %992 = vst.msk [vmem:[%s2024_s1 + $0x3c] sm:$0x1] %vm401_vm6, %v397_v24   ;;  %vm513_vm6 = vcmask 1023296  }
  0xaf   :  { %995 = vst.msk [vmem:[%s2024_s1 + $0x11] sm:$0x1] %vm412_vm7, %v411_v25   ;;  %vm524_vm7 = vcmask 318464  }
  0xb0   :  { %996 = vst.msk [vmem:[%s2024_s1 + $0x11] sm:$0x1] %vm415_vm8, %v411_v25   ;;  %v425_v26 = vpop.permute.xlu0 %424   ;;  %vm527_vm8 = vcmask 1023288  }
  0xb1   :  { %999 = vst.msk [vmem:[%s2024_s1 + $0x3b] sm:$0x1] %vm426_vm9, %v425_v26   ;;  %v439_v27 = vpop.permute.xlu1 %438   ;;  %vm538_vm9 = vcmask 302080  }
  0xb2   :  { %1000 = vst.msk [vmem:[%s2024_s1 + $0x3b] sm:$0x1] %vm429_vm10, %v425_v26   ;;  %vm541_vm10 = vcmask 1023272  }
  0xb3   :  { %1003 = vst.msk [vmem:[%s2024_s1 + $0x10] sm:$0x1] %vm440_vm11, %v439_v27   ;;  %vm552_vm11 = vcmask 293888  }
  0xb4   :  { %1004 = vst.msk [vmem:[%s2024_s1 + $0x10] sm:$0x1] %vm443_vm12, %v439_v27   ;;  %v453_v28 = vpop.permute.xlu0 %452   ;;  %vm555_vm12 = vcmask 1023264  }
  0xb5   :  { %1007 = vst.msk [vmem:[%s2024_s1 + $0x3a] sm:$0x1] %vm454_vm13, %v453_v28   ;;  %v467_v29 = vpop.permute.xlu1 %466   ;;  %vm566_vm13 = vcmask 277504  }
  0xb6   :  { %1008 = vst.msk [vmem:[%s2024_s1 + $0x3a] sm:$0x1] %vm457_vm14, %v453_v28   ;;  %vm569_vm14 = vcmask 1023248  }
  0xb7   :  { %1011 = vst.msk [vmem:[%s2024_s1 + $0xf] sm:$0x1] %vm468_vm15, %v467_v29   ;;  %vm580_vm15 = vcmask 269312  }
  0xb8   :  { %1012 = vst.msk [vmem:[%s2024_s1 + $0xf] sm:$0x1] %vm471_vm0, %v467_v29   ;;  %v481_v30 = vpop.permute.xlu0 %480   ;;  %vm583_vm0 = vcmask 1023240  }
  0xb9   :  { %1015 = vst.msk [vmem:[%s2024_s1 + $0x39] sm:$0x1] %vm482_vm2, %v481_v30   ;;  %v495_v31 = vpop.permute.xlu1 %494   ;;  %vm594_vm2 = vcmask 252928  }
  0xba   :  { %1016 = vst.msk [vmem:[%s2024_s1 + $0x39] sm:$0x1] %vm485_vm3, %v481_v30   ;;  %vm597_vm3 = vcmask 1023224  }
  0xbb   :  { %1019 = vst.msk [vmem:[%s2024_s1 + $0xe] sm:$0x1] %vm496_vm4, %v495_v31   ;;  %vm608_vm4 = vcmask 244736  }
  0xbc   :  { %1020 = vst.msk [vmem:[%s2024_s1 + $0xe] sm:$0x1] %vm499_vm1, %v495_v31   ;;  %v509_v32 = vpop.permute.xlu0 %508   ;;  %vm611_vm1 = vcmask 1023216  }
  0xbd   :  { %1023 = vst.msk [vmem:[%s2024_s1 + $0x38] sm:$0x1] %vm510_vm5, %v509_v32   ;;  %v523_v33 = vpop.permute.xlu1 %522   ;;  %vm622_vm5 = vcmask 228352  }
  0xbe   :  { %1024 = vst.msk [vmem:[%s2024_s1 + $0x38] sm:$0x1] %vm513_vm6, %v509_v32   ;;  %vm625_vm6 = vcmask 1023200  }
  0xbf   :  { %1027 = vst.msk [vmem:[%s2024_s1 + $0xd] sm:$0x1] %vm524_vm7, %v523_v33   ;;  %vm636_vm7 = vcmask 220160  }
  0xc0   :  { %1028 = vst.msk [vmem:[%s2024_s1 + $0xd] sm:$0x1] %vm527_vm8, %v523_v33   ;;  %v537_v34 = vpop.permute.xlu0 %536   ;;  %vm639_vm8 = vcmask 1023192  }
  0xc1   :  { %1031 = vst.msk [vmem:[%s2024_s1 + $0x37] sm:$0x1] %vm538_vm9, %v537_v34   ;;  %v551_v35 = vpop.permute.xlu1 %550   ;;  %vm650_vm9 = vcmask 203776  }
  0xc2   :  { %1032 = vst.msk [vmem:[%s2024_s1 + $0x37] sm:$0x1] %vm541_vm10, %v537_v34   ;;  %vm653_vm10 = vcmask 1023176  }
  0xc3   :  { %1035 = vst.msk [vmem:[%s2024_s1 + $0xc] sm:$0x1] %vm552_vm11, %v551_v35   ;;  %vm664_vm11 = vcmask 195584  }
  0xc4   :  { %1036 = vst.msk [vmem:[%s2024_s1 + $0xc] sm:$0x1] %vm555_vm12, %v551_v35   ;;  %v565_v36 = vpop.permute.xlu0 %564   ;;  %vm667_vm12 = vcmask 1023168  }
  0xc5   :  { %1039 = vst.msk [vmem:[%s2024_s1 + $0x36] sm:$0x1] %vm566_vm13, %v565_v36   ;;  %v579_v37 = vpop.permute.xlu1 %578   ;;  %vm678_vm13 = vcmask 179200  }
  0xc6   :  { %1040 = vst.msk [vmem:[%s2024_s1 + $0x36] sm:$0x1] %vm569_vm14, %v565_v36   ;;  %vm681_vm14 = vcmask 1023152  }
  0xc7   :  { %1043 = vst.msk [vmem:[%s2024_s1 + $0xb] sm:$0x1] %vm580_vm15, %v579_v37   ;;  %vm692_vm15 = vcmask 171008  }
  0xc8   :  { %1044 = vst.msk [vmem:[%s2024_s1 + $0xb] sm:$0x1] %vm583_vm0, %v579_v37   ;;  %v593_v38 = vpop.permute.xlu0 %592   ;;  %vm695_vm0 = vcmask 1023144  }
  0xc9   :  { %1047 = vst.msk [vmem:[%s2024_s1 + $0x35] sm:$0x1] %vm594_vm2, %v593_v38   ;;  %v607_v39 = vpop.permute.xlu1 %606   ;;  %vm706_vm2 = vcmask 154624  }
  0xca   :  { %1048 = vst.msk [vmem:[%s2024_s1 + $0x35] sm:$0x1] %vm597_vm3, %v593_v38   ;;  %vm709_vm3 = vcmask 1023128  }
  0xcb   :  { %1051 = vst.msk [vmem:[%s2024_s1 + $0xa] sm:$0x1] %vm608_vm4, %v607_v39   ;;  %vm720_vm4 = vcmask 146432  }
  0xcc   :  { %1052 = vst.msk [vmem:[%s2024_s1 + $0xa] sm:$0x1] %vm611_vm1, %v607_v39   ;;  %v621_v40 = vpop.permute.xlu0 %620   ;;  %vm723_vm1 = vcmask 1023120  }
  0xcd   :  { %1055 = vst.msk [vmem:[%s2024_s1 + $0x34] sm:$0x1] %vm622_vm5, %v621_v40   ;;  %v635_v41 = vpop.permute.xlu1 %634   ;;  %vm734_vm5 = vcmask 130048  }
  0xce   :  { %1056 = vst.msk [vmem:[%s2024_s1 + $0x34] sm:$0x1] %vm625_vm6, %v621_v40   ;;  %vm737_vm6 = vcmask 1023104  }
  0xcf   :  { %1059 = vst.msk [vmem:[%s2024_s1 + $0x9] sm:$0x1] %vm636_vm7, %v635_v41   ;;  %vm748_vm7 = vcmask 121856  }
  0xd0   :  { %1060 = vst.msk [vmem:[%s2024_s1 + $0x9] sm:$0x1] %vm639_vm8, %v635_v41   ;;  %v649_v42 = vpop.permute.xlu0 %648   ;;  %vm751_vm8 = vcmask 1023096  }
  0xd1   :  { %1063 = vst.msk [vmem:[%s2024_s1 + $0x33] sm:$0x1] %vm650_vm9, %v649_v42   ;;  %v663_v43 = vpop.permute.xlu1 %662   ;;  %vm762_vm9 = vcmask 105472  }
  0xd2   :  { %1064 = vst.msk [vmem:[%s2024_s1 + $0x33] sm:$0x1] %vm653_vm10, %v649_v42   ;;  %vm765_vm10 = vcmask 1023080  }
  0xd3   :  { %1067 = vst.msk [vmem:[%s2024_s1 + $0x8] sm:$0x1] %vm664_vm11, %v663_v43   ;;  %vm776_vm11 = vcmask 97280  }
  0xd4   :  { %1068 = vst.msk [vmem:[%s2024_s1 + $0x8] sm:$0x1] %vm667_vm12, %v663_v43   ;;  %v677_v44 = vpop.permute.xlu0 %676   ;;  %vm779_vm12 = vcmask 1023072  }
  0xd5   :  { %1071 = vst.msk [vmem:[%s2024_s1 + $0x32] sm:$0x1] %vm678_vm13, %v677_v44   ;;  %v691_v45 = vpop.permute.xlu1 %690   ;;  %vm790_vm13 = vcmask 80896  }
  0xd6   :  { %1072 = vst.msk [vmem:[%s2024_s1 + $0x32] sm:$0x1] %vm681_vm14, %v677_v44   ;;  %vm793_vm14 = vcmask 1023056  }
  0xd7   :  { %1075 = vst.msk [vmem:[%s2024_s1 + $0x7] sm:$0x1] %vm692_vm15, %v691_v45   ;;  %vm804_vm15 = vcmask 72704  }
  0xd8   :  { %1076 = vst.msk [vmem:[%s2024_s1 + $0x7] sm:$0x1] %vm695_vm0, %v691_v45   ;;  %v705_v46 = vpop.permute.xlu0 %704   ;;  %vm807_vm0 = vcmask 1023048  }
  0xd9   :  { %1079 = vst.msk [vmem:[%s2024_s1 + $0x31] sm:$0x1] %vm706_vm2, %v705_v46   ;;  %v719_v47 = vpop.permute.xlu1 %718   ;;  %vm818_vm2 = vcmask 56320  }
  0xda   :  { %1080 = vst.msk [vmem:[%s2024_s1 + $0x31] sm:$0x1] %vm709_vm3, %v705_v46   ;;  %vm821_vm3 = vcmask 1023032  }
  0xdb   :  { %1083 = vst.msk [vmem:[%s2024_s1 + $0x6] sm:$0x1] %vm720_vm4, %v719_v47   ;;  %vm832_vm4 = vcmask 48128  }
  0xdc   :  { %1084 = vst.msk [vmem:[%s2024_s1 + $0x6] sm:$0x1] %vm723_vm1, %v719_v47   ;;  %v733_v48 = vpop.permute.xlu0 %732   ;;  %vm835_vm1 = vcmask 1023024  }
  0xdd   :  { %1087 = vst.msk [vmem:[%s2024_s1 + $0x30] sm:$0x1] %vm734_vm5, %v733_v48   ;;  %v747_v49 = vpop.permute.xlu1 %746   ;;  %vm846_vm5 = vcmask 31744  }
  0xde   :  { %1088 = vst.msk [vmem:[%s2024_s1 + $0x30] sm:$0x1] %vm737_vm6, %v733_v48   ;;  %vm849_vm6 = vcmask 1023008  }
  0xdf   :  { %1091 = vst.msk [vmem:[%s2024_s1 + $0x5] sm:$0x1] %vm748_vm7, %v747_v49   ;;  %vm859_vm7 = vcmask 23552  }
  0xe0   :  { %1092 = vst.msk [vmem:[%s2024_s1 + $0x5] sm:$0x1] %vm751_vm8, %v747_v49   ;;  %v761_v50 = vpop.permute.xlu0 %760   ;;  %vm862_vm8 = vcmask 1023000  }
  0xe1   :  { %1095 = vst.msk [vmem:[%s2024_s1 + $0x2f] sm:$0x1] %vm762_vm9, %v761_v50   ;;  %v775_v51 = vpop.permute.xlu1 %774   ;;  %vm873_vm9 = vcmask 7168  }
  0xe2   :  { %1096 = vst.msk [vmem:[%s2024_s1 + $0x2f] sm:$0x1] %vm765_vm10, %v761_v50   ;;  %vm876_vm10 = vcmask 1022984  }
  0xe3   :  { %1099 = vst.msk [vmem:[%s2024_s1 + $0x4] sm:$0x1] %vm776_vm11, %v775_v51  }
  0xe4   :  { %1100 = vst.msk [vmem:[%s2024_s1 + $0x4] sm:$0x1] %vm779_vm12, %v775_v51   ;;  %v789_v52 = vpop.permute.xlu0 %788  }
  0xe5   :  { %1103 = vst.msk [vmem:[%s2024_s1 + $0x2e] sm:$0x1] %vm790_vm13, %v789_v52   ;;  %v803_v53 = vpop.permute.xlu1 %802  }
  0xe6   :  { %1104 = vst.msk [vmem:[%s2024_s1 + $0x2e] sm:$0x1] %vm793_vm14, %v789_v52  }
  0xe7   :  { %1107 = vst.msk [vmem:[%s2024_s1 + $0x3] sm:$0x1] %vm804_vm15, %v803_v53  }
  0xe8   :  { %1108 = vst.msk [vmem:[%s2024_s1 + $0x3] sm:$0x1] %vm807_vm0, %v803_v53   ;;  %v817_v54 = vpop.permute.xlu0 %816  }
  0xe9   :  { %1111 = vst.msk [vmem:[%s2024_s1 + $0x2d] sm:$0x1] %vm818_vm2, %v817_v54   ;;  %v831_v55 = vpop.permute.xlu1 %830  }
  0xea   :  { %1112 = vst.msk [vmem:[%s2024_s1 + $0x2d] sm:$0x1] %vm821_vm3, %v817_v54  }
  0xeb   :  { %1115 = vst.msk [vmem:[%s2024_s1 + $0x2] sm:$0x1] %vm832_vm4, %v831_v55  }
  0xec   :  { %1116 = vst.msk [vmem:[%s2024_s1 + $0x2] sm:$0x1] %vm835_vm1, %v831_v55   ;;  %v845_v56 = vpop.permute.xlu0 %844  }
  0xed   :  { %1119 = vst.msk [vmem:[%s2024_s1 + $0x2c] sm:$0x1] %vm846_vm5, %v845_v56   ;;  %v858_v57 = vpop.permute.xlu1 %857  }
  0xee   :  { %1120 = vst.msk [vmem:[%s2024_s1 + $0x2c] sm:$0x1] %vm849_vm6, %v845_v56  }
  0xef   :  { %1122 = vst.msk [vmem:[%s2024_s1 + $0x1] sm:$0x1] %vm859_vm7, %v858_v57  }
  0xf0   :  { %1123 = vst.msk [vmem:[%s2024_s1 + $0x1] sm:$0x1] %vm862_vm8, %v858_v57   ;;  %v872_v58 = vpop.permute.xlu0 %871  }
  0xf1   :  { %1126 = vst.msk [vmem:[%s2024_s1 + $0x2b] sm:$0x1] %vm873_vm9, %v872_v58  }
  0xf2   :  { %1127 = vst.msk [vmem:[%s2024_s1 + $0x2b] sm:$0x1] %vm876_vm10, %v872_v58  }

// kernel: embedding_forward.1
= control target key start
LH: loop header
LB: loop body
LE: loop exit
PB: predicated region body
PF: predicated region fallthrough
CT: control target
= control target key end

     0   :  { %s798_s9 = smov 0   ;;  %s921_s0 = inlined_call_operand.vmem [shape: bf16[64,512], index: 0, kind: input, shape index: {}]   ;;  %s922_s1 = inlined_call_operand.vmem [shape: bf16[512,32], index: 1, kind: input, shape index: {}]   ;;  %s923_s2 = inlined_call_operand.vmem [shape: f32[64,32], index: 2, kind: output, shape index: {}]  }
   0x1 LB: > { %s614_s10 = sadd.s32 4294967295, %s781_s9   ;;  %p618_p0 = scmp.ge.s32.totalorder %s781_s9, 1  ;;  %s781_s9 = sphi %s798_s9, %s12_s9  }
   0x2   : > { %p114_p1 = scmp.lt.s32.totalorder %s781_s9, 3 }
   0x4   : > { %p115_p2 = pnand %p618_p0, %p114_p1 }
   0x5   : > { %s619_s17 = sshll.u32 (!%p115_p2), %s614_s10, 2 }
   0x6   : > { %118 = sbr.rel (%p115_p2) target bundleno = 258 (0x102), region = 28  ;;  %p138_p3 = scmp.lt.s32.totalorder (!%p115_p2), %s619_s17, 7 }
   0xb   : > { %v731_v0 = vld [vmem:[%s922_s1 + $0x78] sm:$0xff]   ;;  %v735_v4 = vld [vmem:[%s922_s1 + $0x70] sm:$0xff]   ;;  %v739_v8 = vld [vmem:[%s922_s1 + $0x68] sm:$0xff]   ;;  %s925_s17 = smov (!%p138_p3, %s619_s17), 7  ;;  %vm553_vm0 = vcmask 261120  }
   0xc   : > { %v732_v1 = vld [vmem:[%s922_s1 + $0xf8] sm:$0xff]   ;;  %667 = vmatprep.subr.bf16.mxu0 %v731_v0  ;;  %v736_v5 = vld [vmem:[%s922_s1 + $0xf0] sm:$0xff]   ;;  %v740_v9 = vld [vmem:[%s922_s1 + $0xe8] sm:$0xff]   ;;  %s666_s13 = sshll.u32 %s925_s17, 4  ;;  %s623_s27 = sshll.u32 %s925_s17, 3 }
   0xd   : > { %v733_v2 = vld [vmem:[%s922_s1 + $0x38] sm:$0xff]   ;;  %695 = vmatprep.subr.bf16.mxu1 %v732_v1  ;;  %v737_v6 = vld [vmem:[%s922_s1 + $0x30] sm:$0xff]   ;;  %v741_v10 = vld [vmem:[%s922_s1 + $0x28] sm:$0xff]   ;;  %s142_s23 = scalar_lea.vmem %s921_s0, %s666_s13  ;;  %s148_s30 = scalar_lea.vmem %s923_s2, %s623_s27 }
   0xe   : > { %v734_v3 = vld [vmem:[%s922_s1 + $0xb8] sm:$0xff]   ;;  %668 = vmatpush3.bf16.msra.mxu0 %v733_v2  ;;  %v738_v7 = vld [vmem:[%s922_s1 + $0xb0] sm:$0xff]   ;;  %v742_v11 = vld [vmem:[%s922_s1 + $0xa8] sm:$0xff]  }
   0xf   : > { %696 = vmatpush3.bf16.msra.mxu1 %v734_v3  ;;  %669 = vmatprep.subr.bf16.mxu0 %v735_v4  ;;  %v743_v12 = vld [vmem:[%s922_s1 + $0x60] sm:$0xff]   ;;  %v747_v16 = vld [vmem:[%s922_s1 + $0x58] sm:$0xff]   ;;  %v751_v20 = vld [vmem:[%s922_s1 + $0x50] sm:$0xff]  }
  0x10   : > { %697 = vmatprep.subr.bf16.mxu1 %v736_v5  ;;  %v744_v13 = vld [vmem:[%s922_s1 + $0xe0] sm:$0xff]   ;;  %v748_v17 = vld [vmem:[%s922_s1 + $0xd8] sm:$0xff]   ;;  %v752_v21 = vld [vmem:[%s922_s1 + $0xd0] sm:$0xff]  }
  0x11   : > { %v745_v14 = vld [vmem:[%s922_s1 + $0x20] sm:$0xff]   ;;  %v749_v18 = vld [vmem:[%s922_s1 + $0x18] sm:$0xff]   ;;  %v753_v22 = vld [vmem:[%s922_s1 + $0x10] sm:$0xff]  }
  0x12   : > { %670 = vmatpush3.bf16.msra.mxu0 %v737_v6  ;;  %v746_v15 = vld [vmem:[%s922_s1 + $0xa0] sm:$0xff]   ;;  %v750_v19 = vld [vmem:[%s922_s1 + $0x98] sm:$0xff]   ;;  %v754_v23 = vld [vmem:[%s922_s1 + $0x90] sm:$0xff]  }
  0x13   : > { %698 = vmatpush3.bf16.msra.mxu1 %v738_v7  ;;  %671 = vmatprep.subr.bf16.mxu0 %v739_v8  ;;  %v755_v24 = vld [vmem:[%s922_s1 + $0x48] sm:$0xff]   ;;  %v759_v28 = vld [vmem:[%s922_s1 + $0x40] sm:$0xff]  }
  0x14   : > { %699 = vmatprep.subr.bf16.mxu1 %v740_v9  ;;  %v756_v25 = vld [vmem:[%s922_s1 + $0xc8] sm:$0xff]   ;;  %v760_v29 = vld [vmem:[%s922_s1 + $0xc0] sm:$0xff]  }
  0x15   : > { %v757_v26 = vld [vmem:[%s922_s1 + $0x8] sm:$0xff]   ;;  %v761_v30 = vld [vmem:[%s922_s1] sm:$0xff]  }
  0x16   : > { %672 = vmatpush3.bf16.msra.mxu0 %v741_v10  ;;  %v758_v27 = vld [vmem:[%s922_s1 + $0x88] sm:$0xff]   ;;  %v762_v31 = vld [vmem:[%s922_s1 + $0x80] sm:$0xff]  }
  0x17   : > { %700 = vmatpush3.bf16.msra.mxu1 %v742_v11  ;;  %673 = vmatprep.subr.bf16.mxu0 %v743_v12  ;;  %v763_v32 = vld [vmem:[%s142_s23] ss:$16 sps:$4 sm:$0xff]   ;;  %v765_v33 = vld [vmem:[%s142_s23 + $0x4] ss:$16 sps:$4 sm:$0xff]   ;;  %v766_v34 = vld [vmem:[%s142_s23 + $0x8] ss:$16 sps:$4 sm:$0xff]  }
  0x18   : > { %701 = vmatprep.subr.bf16.mxu1 %v744_v13  ;;  %v768_v35 = vld [vmem:[%s142_s23 + $0xc] ss:$16 sps:$4 sm:$0xff]   ;;  %487 = vmatprep.mubr.bf16.mxu0 %v765_v33  ;;  %v769_v36 = vld [vmem:[%s142_s23 + $0x24] ss:$16 sps:$4 sm:$0xff]   ;;  %v773_v38 = vld [vmem:[%s142_s23 + $0x20] ss:$16 sps:$4 sm:$0xff]  }
  0x19   : > { %536 = vmatprep.mubr.bf16.mxu1 %v768_v35  ;;  %v771_v37 = vld [vmem:[%s142_s23 + $0x2c] ss:$16 sps:$4 sm:$0xff]   ;;  %v774_v39 = vld [vmem:[%s142_s23 + $0x28] ss:$16 sps:$4 sm:$0xff]  }
  0x1a   : > { %674 = vmatpush3.bf16.msra.mxu0 %v745_v14 }
  0x1b   : > { %702 = vmatpush3.bf16.msra.mxu1 %v746_v15  ;;  %675 = vmatprep.subr.bf16.mxu0 %v747_v16 }
  0x1c   : > { %703 = vmatprep.subr.bf16.mxu1 %v748_v17 }
  0x1e   : > { %676 = vmatpush3.bf16.msra.mxu0 %v749_v18 }
  0x1f   : > { %704 = vmatpush3.bf16.msra.mxu1 %v750_v19  ;;  %677 = vmatprep.subr.bf16.mxu0 %v751_v20 }
  0x20   : > { %705 = vmatprep.subr.bf16.mxu1 %v752_v21 }
  0x22   : > { %678 = vmatpush3.bf16.msra.mxu0 %v753_v22 }
  0x23   : > { %706 = vmatpush3.bf16.msra.mxu1 %v754_v23  ;;  %679 = vmatprep.subr.bf16.mxu0 %v755_v24 }
  0x24   : > { %707 = vmatprep.subr.bf16.mxu1 %v756_v25 }
  0x26   : > { %680 = vmatpush3.bf16.msra.mxu0 %v757_v26 }
  0x27   : > { %708 = vmatpush3.bf16.msra.mxu1 %v758_v27  ;;  %681 = vmatprep.subr.bf16.mxu0 %v759_v28 }
  0x28   : > { %709 = vmatprep.subr.bf16.mxu1 %v760_v29 }
  0x2a   : > { %682 = vmatpush3.bf16.msra.mxu0 %v761_v30 }
  0x2b   : > { %710 = vmatpush3.bf16.msra.mxu1 %v762_v31 }
  0x2d   : > { %488 = vmatmul.mubr.bf16.vlgmr.msra.gmra.mxu0 %v763_v32 }
  0x2e   : > { %537 = vmatmul.mubr.bf16.vlgmr.msra.gmra.mxu1 %v766_v34  ;;  %495 = vmatprep.mubr.bf16.mxu0 %v769_v36 }
  0x2f   : > { %544 = vmatprep.mubr.bf16.mxu1 %v771_v37 }
  0x35   : > { %496 = vmatmul.mubr.bf16.gmra.mxu0 %v773_v38 }
  0x36   : > { %545 = vmatmul.mubr.bf16.gmra.mxu1 %v774_v39 }
  0xed   : > { %v683_v40 = vpop.f32.mrf.mxu0 }
  0xee   : > { %v711_v41 = vpop.f32.mrf.mxu1 }
  0xef   : > { %v684_v42 = vpop.f32.mrf.mxu0 }
  0xf0   : > { %v685_v43 = vadd.f32 %v684_v42, %v683_v40  ;;  %v712_v44 = vpop.f32.mrf.mxu1 }
  0xf1   : > { %v713_v45 = vadd.f32 %v712_v44, %v711_v41  ;;  %v686_v46 = vpop.f32.mrf.mxu0 }
  0xf2   : > { %v714_v47 = vpop.f32.mrf.mxu1 }
  0xf3   : > { %v539_v48 = vadd.f32 %v713_v45, %v685_v43  ;;  %v687_v49 = vpop.f32.mrf.mxu0 }
  0xf4   : > { %v688_v50 = vadd.f32 %v687_v49, %v686_v46  ;;  %v715_v51 = vpop.f32.mrf.mxu1 }
  0xf5   : > { %554 = vst.msk [vmem:[%s148_s30] sm:$0xff] %vm553_vm0, %v539_v48  ;;  %v716_v52 = vadd.f32 %v715_v51, %v714_v47  ;;  %v689_v53 = vpop.f32.mrf.mxu0 }
  0xf6   : > { %v717_v54 = vpop.f32.mrf.mxu1 }
  0xf7   : > { %v542_v55 = vadd.f32 %v716_v52, %v688_v50  ;;  %v690_v56 = vpop.f32.mrf.mxu0 }
  0xf8   : > { %v691_v57 = vadd.f32 %v690_v56, %v689_v53  ;;  %v718_v58 = vpop.f32.mrf.mxu1 }
  0xf9   : > { %555 = vst.msk [vmem:[%s148_s30 + $0x8] sm:$0xff] %vm553_vm0, %v542_v55  ;;  %v719_v59 = vadd.f32 %v718_v58, %v717_v54  ;;  %v692_v60 = vpop.f32.mrf.mxu0 }
  0xfa   : > { %v720_v61 = vpop.f32.mrf.mxu1 }
  0xfb   : > { %v547_v62 = vadd.f32 %v719_v59, %v691_v57  ;;  %v693_v63 = vpop.f32.mrf.mxu0 }
  0xfc   : > { %v694_v0 = vadd.f32 %v693_v63, %v692_v60  ;;  %v721_v1 = vpop.f32.mrf.mxu1 }
  0xfd   : > { %556 = vst.msk [vmem:[%s148_s30 + $0x10] sm:$0xff] %vm553_vm0, %v547_v62  ;;  %v722_v2 = vadd.f32 %v721_v1, %v720_v61 }
  0xff   : > { %v550_v3 = vadd.f32 %v722_v2, %v694_v0 }
 0x101   : > { %557 = vst.msk [vmem:[%s148_s30 + $0x18] sm:$0xff] %vm553_vm0, %v550_v3 }
 0x102 PF: > { %s12_s9 = sadd.s32 1, %s781_s9  }
 0x103   : > { %p9_p4 = scmp.ge.s32.totalorder %s12_s9, 4  }
 0x105   :  { %11 = sbr.rel (!%p9_p4) target bundleno = 1 (0x1), region = 58 }

</bundles_post_ra>
